<compile_context>
chip_gen: v7x
topology: tpu7x:2x2x1
jax: 0.10.0
libtpu: 0.0.40
codegen_flags: <defaults>
</compile_context>

<pallas_src>
import jax
import jax.numpy as jnp
from jax.experimental import pallas as pl
from jax.experimental.pallas import tpu as pltpu

_F32 = 4  # bytes


def _projection_head_kernel(x_ref, w1_ref, w2_ref, o_ref, acc_ref):
    """One (batch-tile, hidden-tile) grid step of relu(x @ W1t) @ W2t."""
    k = pl.program_id(1)

    @pl.when(k == 0)
    def _init():
        acc_ref[...] = jnp.zeros_like(acc_ref)

    # hidden_k = relu(x @ W1t[:, k-tile]) : NN form (contract x's last dim with
    # the pre-transposed weight's FIRST dim), f32 MXU accumulation.
    h = jnp.dot(x_ref[...], w1_ref[...], preferred_element_type=jnp.float32)
    h = jnp.maximum(h, 0.0).astype(w2_ref.dtype)   # ReLU + cast in one temp

    # acc += hidden_k @ W2t[k-tile, :]
    acc_ref[...] += jnp.dot(h, w2_ref[...], preferred_element_type=jnp.float32)

    @pl.when(k == pl.num_programs(1) - 1)
    def _finalize():
        o_ref[...] = acc_ref[...].astype(o_ref.dtype)


def _round_up(n, m):
    return ((n + m - 1) // m) * m


def _vmem_budget_bytes():
    """(planner budget, vmem_limit) derived from this chip's per-core VMEM."""
    try:
        cap = int(pltpu.get_tpu_info().vmem_capacity_bytes)
    except Exception:
        cap = 64 * 1024 * 1024           # conservative v7x floor (per TensorCore)
    budget = int(cap * 0.70)
    limit = min(int(cap * 0.90), 128 * 1024 * 1024)
    return budget, limit


def _plan_tiles(B, in_p, hid_p, out_p, itemsize, budget_bytes):
    """Pick (batch tile TM, hidden tile TK).

    TK == hid_p means fully-resident (single-buffered) weights; TK < hid_p
    means the hidden dim is K-tiled and the weights stream (double-buffered).
    """
    sublane = {4: 8, 2: 16, 1: 32}.get(itemsize, 8)
    b_aligned = _round_up(max(B, sublane), sublane)

    # Keep >=2 batch tiles once the batch is big enough, so the "parallel"
    # batch axis actually splits across v7x's two TensorCores.
    if b_aligned > 256:
        tm_cap = min(512, _round_up((b_aligned + 1) // 2, sublane))
    else:
        tm_cap = b_aligned
    tm_candidates = [c for c in (512, 384, 256, 128) if c <= tm_cap] or [tm_cap]

    def footprint(tm, tk, resident_weights):
        w_bufs = 1 if resident_weights else 2          # Buffered(1) vs streamed
        w = w_bufs * (in_p * tk + tk * out_p) * itemsize
        x = 2 * tm * in_p * itemsize                   # double-buffered x tile
        o = 2 * tm * out_p * itemsize                  # double-buffered out tile
        h = tm * tk * _F32                             # f32 hidden temporary
        if itemsize < _F32:
            h += tm * tk * itemsize                    # casted copy fed to MXU
        acc = tm * out_p * _F32                        # f32 accumulator scratch
        return w + x + o + h + acc

    # Preferred: weights fully resident in VMEM, no K tiling.
    for tm in tm_candidates:
        if footprint(tm, hid_p, True) <= budget_bytes:
            return tm, hid_p
    # Fallback: K-tile the hidden dim with an f32 accumulator.
    for tm in tm_candidates:
        for tk in (2048, 1024, 512, 256, 128):
            if tk < hid_p and footprint(tm, tk, False) <= budget_bytes:
                return tm, tk
    # Last resort: smallest tiles; vmem_limit_bytes keeps ~20% headroom.
    return tm_candidates[-1], min(hid_p, 128)


def _weight_block_spec(shape, index_map, single_buffered):
    if single_buffered:
        try:
            # Block index never changes across the grid -> one buffer suffices.
            return pl.BlockSpec(shape, index_map, pipeline_mode=pl.Buffered(1))
        except TypeError:
            pass  # jax build without pipeline_mode on BlockSpec: use default
    return pl.BlockSpec(shape, index_map)


def projection_head_forward(x, w1, w2):
    """x: [B, in_f]; w1: [hidden_f, in_f]; w2: [out_f, hidden_f] (PyTorch layout)."""
    B, in_f = x.shape
    hidden_f, in_f_w = w1.shape
    out_f, hidden_f_w = w2.shape
    assert in_f == in_f_w and hidden_f == hidden_f_w

    # TODO(synk): with an accuracy sign-off, cast x/w1/w2 to bf16 here (keeping
    # the f32 MXU accumulation) — bf16 is the native MXU rate on v5e/v6e/v7x.

    LANE = 128
    in_p = _round_up(in_f, LANE)
    hid_p = _round_up(hidden_f, LANE)
    out_p = _round_up(out_f, LANE)

    itemsize = jnp.dtype(x.dtype).itemsize
    budget, vmem_limit = _vmem_budget_bytes()
    tm, tk = _plan_tiles(B, in_p, hid_p, out_p, itemsize, budget)

    hid_p = _round_up(hid_p, tk)                 # hidden padded to multiple of TK
    B_p = _round_up(max(B, tm), tm)
    nb, nk = B_p // tm, hid_p // tk
    resident = nk == 1

    # One-time wrapper-side transpose (+ zero pad) to NN layout.  Zero padding
    # is inert through matmul + ReLU + matmul and is sliced off at the end.
    xp = jnp.pad(x, ((0, B_p - B), (0, in_p - in_f)))
    w1t = jnp.pad(w1.T, ((0, in_p - in_f), (0, hid_p - hidden_f)))     # [in_p, hid_p]
    w2t = jnp.pad(w2.T, ((0, hid_p - hidden_f), (0, out_p - out_f)))   # [hid_p, out_p]

    flops = 2 * B_p * in_p * hid_p + 2 * B_p * hid_p * out_p
    w_reads = 1 if resident else nb
    bytes_accessed = (xp.size + w_reads * (w1t.size + w2t.size)
                      + B_p * out_p) * itemsize

    in_specs = [
        pl.BlockSpec((tm, in_p), lambda i, k: (i, 0)),                   # x: streamed over batch, resident over k
        _weight_block_spec((in_p, tk), lambda i, k: (0, k), resident),   # W1t
        _weight_block_spec((tk, out_p), lambda i, k: (k, 0), resident),  # W2t
    ]

    out_padded = pl.pallas_call(
        _projection_head_kernel,
        out_shape=jax.ShapeDtypeStruct((B_p, out_p), x.dtype),
        grid_spec=pltpu.PrefetchScalarGridSpec(
            num_scalar_prefetch=0,
            grid=(nb, nk),                       # (batch tiles, hidden/K tiles)
            in_specs=in_specs,
            out_specs=pl.BlockSpec((tm, out_p), lambda i, k: (i, 0)),
            scratch_shapes=[pltpu.VMEM((tm, out_p), jnp.float32)],
        ),
        compiler_params=pltpu.CompilerParams(
            dimension_semantics=("parallel", "arbitrary"),  # megacore on batch
            vmem_limit_bytes=vmem_limit,
        ),
        cost_estimate=pl.CostEstimate(
            flops=flops, transcendentals=0, bytes_accessed=bytes_accessed),
    )(xp, w1t, w2t)

    return out_padded[:B, :out_f]


if __name__ == "__main__":
    # Small shapes consistent with the module's forward: x is [batch, in_features].
    B, in_f, hidden_f, out_f = 8, 32, 64, 16

    key = jax.random.PRNGKey(0)
    kx, k1, k2 = jax.random.split(key, 3)

    x = jax.random.normal(kx, (B, in_f), dtype=jnp.float32)
    # Deterministic weight init mimicking nn.Linear's U(-1/sqrt(fan_in), 1/sqrt(fan_in)).
    b1 = 1.0 / jnp.sqrt(in_f)
    b2 = 1.0 / jnp.sqrt(hidden_f)
    w1 = jax.random.uniform(k1, (hidden_f, in_f), minval=-b1, maxval=b1,
                            dtype=jnp.float32)   # PyTorch layout [out, in]
    w2 = jax.random.uniform(k2, (out_f, hidden_f), minval=-b2, maxval=b2,
                            dtype=jnp.float32)

    out = projection_head_forward(x, w1, w2)
    out = jax.block_until_ready(out)

    # Pure-JAX reference check of the same semantics.
    ref = jnp.maximum(x @ w1.T, 0.0) @ w2.T
    assert out.shape == (B, out_f)
    assert jnp.allclose(out, ref, atol=1e-5, rtol=1e-5)

    print("KERNEL_OK")
</pallas_src>

<mosaic_0001>
module attributes {stable_mosaic.version = 11 : i64} {
  func.func @_projection_head_kernel(%arg0: i32, %arg1: i32, %arg2: memref<8x128xf32, #tpu.memory_space<vmem>>, %arg3: memref<128x128xf32, #tpu.memory_space<vmem>>, %arg4: memref<128x128xf32, #tpu.memory_space<vmem>>, %arg5: memref<8x128xf32, #tpu.memory_space<vmem>>, %arg6: memref<8x128xf32, #tpu.memory_space<vmem>>) attributes {dimension_semantics = [#tpu.dimension_semantics<parallel>, #tpu.dimension_semantics<arbitrary>], iteration_bounds = array<i64: 1, 1>, scalar_prefetch = 0 : i64, scratch_operands = 1 : i64, tpu.core_type = #tpu.core_type<tc>, window_params = [{transform_indices = @transform_0, window_bounds = array<i64: 8, 128>}, {pipeline_mode = #tpu.pipeline_mode<synchronous>, transform_indices = @transform_1, window_bounds = array<i64: 128, 128>}, {pipeline_mode = #tpu.pipeline_mode<synchronous>, transform_indices = @transform_2, window_bounds = array<i64: 128, 128>}, {transform_indices = @transform_3, window_bounds = array<i64: 8, 128>}]} {
    %c0_i32 = arith.constant 0 : i32
    %0 = arith.cmpi eq, %arg1, %c0_i32 : i32
    %1 = arith.extui %0 : i1 to i32
    %c0_i32_0 = arith.constant 0 : i32
    %2 = arith.cmpi ne, %1, %c0_i32_0 : i32
    scf.if %2 {
      %cst_14 = arith.constant 0.000000e+00 : f32
      %16 = vector.broadcast %cst_14 : f32 to vector<8x128xf32>
      %c0_15 = arith.constant 0 : index
      %c0_16 = arith.constant 0 : index
      %17 = vector.load %arg6[%c0_15, %c0_16] : memref<8x128xf32, #tpu.memory_space<vmem>>, vector<8x128xf32>
      tpu.vector_store %arg6[%c0_15, %c0_16], %16 {strides = array<i32>} : memref<8x128xf32, #tpu.memory_space<vmem>>, vector<8x128xf32>,
    } else {
    }
    %c0 = arith.constant 0 : index
    %c0_1 = arith.constant 0 : index
    %3 = vector.load %arg2[%c0, %c0_1] : memref<8x128xf32, #tpu.memory_space<vmem>>, vector<8x128xf32>
    %c0_2 = arith.constant 0 : index
    %c0_3 = arith.constant 0 : index
    %4 = vector.load %arg3[%c0_2, %c0_3] : memref<128x128xf32, #tpu.memory_space<vmem>>, vector<128x128xf32>
    %cst = arith.constant dense<0.000000e+00> : vector<8x128xf32>
    %5 = tpu.matmul %3, %4, %cst {dimension_numbers = #tpu.dot_dimension_numbers<[1], [0], [0], [1], [0, 0, 1, 1], [], []>} : vector<8x128xf32>, vector<128x128xf32>, vector<8x128xf32> -> vector<8x128xf32>
    %cst_4 = arith.constant 0.000000e+00 : f32
    %6 = vector.broadcast %cst_4 : f32 to vector<8x128xf32>
    %7 = arith.maximumf %5, %6 : vector<8x128xf32>
    %c0_5 = arith.constant 0 : index
    %c0_6 = arith.constant 0 : index
    %8 = vector.load %arg6[%c0_5, %c0_6] : memref<8x128xf32, #tpu.memory_space<vmem>>, vector<8x128xf32>
    %c0_7 = arith.constant 0 : index
    %c0_8 = arith.constant 0 : index
    %9 = vector.load %arg4[%c0_7, %c0_8] : memref<128x128xf32, #tpu.memory_space<vmem>>, vector<128x128xf32>
    %cst_9 = arith.constant dense<0.000000e+00> : vector<8x128xf32>
    %10 = tpu.matmul %7, %9, %cst_9 {dimension_numbers = #tpu.dot_dimension_numbers<[1], [0], [0], [1], [0, 0, 1, 1], [], []>} : vector<8x128xf32>, vector<128x128xf32>, vector<8x128xf32> -> vector<8x128xf32>
    %11 = arith.addf %8, %10 : vector<8x128xf32>
    %c0_10 = arith.constant 0 : index
    %c0_11 = arith.constant 0 : index
    %12 = vector.load %arg6[%c0_10, %c0_11] : memref<8x128xf32, #tpu.memory_space<vmem>>, vector<8x128xf32>
    tpu.vector_store %arg6[%c0_10, %c0_11], %11 {strides = array<i32>} : memref<8x128xf32, #tpu.memory_space<vmem>>, vector<8x128xf32>,
    %c0_i32_12 = arith.constant 0 : i32
    %13 = arith.cmpi eq, %arg1, %c0_i32_12 : i32
    %14 = arith.extui %13 : i1 to i32
    %c0_i32_13 = arith.constant 0 : i32
    %15 = arith.cmpi ne, %14, %c0_i32_13 : i32
    scf.if %15 {
      %c0_14 = arith.constant 0 : index
      %c0_15 = arith.constant 0 : index
      %16 = vector.load %arg6[%c0_14, %c0_15] : memref<8x128xf32, #tpu.memory_space<vmem>>, vector<8x128xf32>
      %c0_16 = arith.constant 0 : index
      %c0_17 = arith.constant 0 : index
      %17 = vector.load %arg5[%c0_16, %c0_17] : memref<8x128xf32, #tpu.memory_space<vmem>>, vector<8x128xf32>
      tpu.vector_store %arg5[%c0_16, %c0_17], %16 {strides = array<i32>} : memref<8x128xf32, #tpu.memory_space<vmem>>, vector<8x128xf32>,
    } else {
    }
    return
  }
  func.func @transform_0(%arg0: i32, %arg1: i32) -> (i32, i32) {
    %c0_i32 = arith.constant 0 : i32
    %c0_i32_0 = arith.constant 0 : i32
    return %arg0, %c0_i32 : i32, i32
  }
  func.func @transform_1(%arg0: i32, %arg1: i32) -> (i32, i32) {
    %c0_i32 = arith.constant 0 : i32
    %c0_i32_0 = arith.constant 0 : i32
    return %c0_i32, %arg1 : i32, i32
  }
  func.func @transform_2(%arg0: i32, %arg1: i32) -> (i32, i32) {
    %c0_i32 = arith.constant 0 : i32
    %c0_i32_0 = arith.constant 0 : i32
    return %arg1, %c0_i32 : i32, i32
  }
  func.func @transform_3(%arg0: i32, %arg1: i32) -> (i32, i32) {
    %c0_i32 = arith.constant 0 : i32
    %c0_i32_0 = arith.constant 0 : i32
    return %arg0, %c0_i32 : i32, i32
  }
}

</mosaic_0001>

<bundles_post_ra>
// kernel: tpu_custom_call.1
= control target key start
LH: loop header
LB: loop body
LE: loop exit
PB: predicated region body
PF: predicated region fallthrough
CT: control target
= control target key end

     0   :  { %8 = vsyncpa [#allocation4], 0  ;;  %s611_s0 = inlined_call_operand.hbm [shape: f32[8,128], index: 0, kind: input, shape index: {}]   ;;  %s612_s1 = inlined_call_operand.hbm [shape: f32[128,128], index: 1, kind: input, shape index: {}]   ;;  %s613_s2 = inlined_call_operand.hbm [shape: f32[128,128], index: 2, kind: input, shape index: {}]   ;;  %s614_s3 = inlined_call_operand.hbm [shape: f32[8,128], index: 3, kind: output, shape index: {}]  }
   0x1   :  { %9 = vsyncpa [#allocation7], 0 }
   0x2   :  { %10 = vsyncpa [#allocation5], 0  ;;  %s512_s12 = smov [#allocation6]   ;;  %s418_s16 = scalar_lea.hbm %s612_s1, 2048 }
   0x3   :  { %s26_s13 = sshll.u32 %s512_s12, 4  ;;  %p419_p0 = scmp.ne.s32.totalorder %s612_s1, %s418_s16  ;;  %s27_s13 = int_to_ptr.vmem [resolvable:$true] %s26_s13 }
   0x4   :  { %p422_p1 = scmp.lt.u32.totalorder %s418_s16, %s612_s1 }
   0x6   :  { %p424_p2 = pnand %p422_p1, %p419_p0 }
   0x8   :  { %427 = shalt.err (!%p424_p2)
}
   0x9   :  { %s428_s21 = scalar_lea.vmem %s27_s13, 2048  ;;  %p433_p4 = scmp.lt.s32.totalorder %s27_s13, %s27_s13 }
   0xa   :  { %p429_p3 = scmp.ne.s32.totalorder %s27_s13, %s428_s21  ;;  %p434_p5 = scmp.lt.s32.totalorder %s428_s21, %s428_s21 }
   0xc   :  { %p435_p6 = por %p434_p5, %p433_p4 }
   0xe   :  { %p436_p7 = pnand %p435_p6, %p429_p3 }
  0x10   :  { %439 = shalt.err (!%p436_p7)
}
  0x11   :  { %s513_s22 = smov 128   ;;  %s514_s23 = smov 8  }
  0x12   :  { %32 = dma.hbm_to_vmem [thread:$0]  %s612_s1, 2048, %s27_s13, [#allocation7], %s513_s22, %s513_s22, %s514_s23  }
  0x13   :  { %s515_s26 = smov [#allocation3]   ;;  %s516_s28 = smov [#allocation8]  }
  0x14   :  { %s17_s27 = sshll.u32 %s515_s26, 4  ;;  %s38_s29 = sshll.u32 %s516_s28, 4  ;;  %s18_s27 = int_to_ptr.vmem [resolvable:$true] %s17_s27  ;;  %s39_s29 = int_to_ptr.vmem [resolvable:$true] %s38_s29 }
  0x15   :  { %s440_s5 = scalar_lea.hbm %s611_s0, 128 }
  0x16   :  { %p441_p8 = scmp.ne.s32.totalorder %s611_s0, %s440_s5  ;;  %p444_p9 = scmp.lt.u32.totalorder %s440_s5, %s611_s0 }
  0x18   :  { %p446_p10 = pnand %p444_p9, %p441_p8 }
  0x1a   :  { %449 = shalt.err (!%p446_p10)
}
  0x1b   :  { %s450_s1 = scalar_lea.vmem %s18_s27, 128  ;;  %p455_p12 = scmp.lt.s32.totalorder %s18_s27, %s18_s27 }
  0x1c   :  { %p451_p11 = scmp.ne.s32.totalorder %s18_s27, %s450_s1  ;;  %p456_p13 = scmp.lt.s32.totalorder %s450_s1, %s450_s1 }
  0x1e   :  { %p457_p0 = por %p456_p13, %p455_p12 }
  0x20   :  { %p458_p1 = pnand %p457_p0, %p451_p11 }
  0x22   :  { %461 = shalt.err (!%p458_p1)
}
  0x23   :  { %20 = dma.hbm_to_vmem [thread:$0]  %s611_s0, 128, %s18_s27, [#allocation4]  }
  0x24   :  { %s462_s14 = scalar_lea.hbm %s613_s2, 2048 }
  0x25   :  { %p463_p2 = scmp.ne.s32.totalorder %s613_s2, %s462_s14  ;;  %p466_p3 = scmp.lt.u32.totalorder %s462_s14, %s613_s2 }
  0x27   :  { %p468_p4 = pnand %p466_p3, %p463_p2 }
  0x29   :  { %471 = shalt.err (!%p468_p4)
}
  0x2a   :  { %s472_s19 = scalar_lea.vmem %s39_s29, 2048  ;;  %p477_p6 = scmp.lt.s32.totalorder %s39_s29, %s39_s29 }
  0x2b   :  { %p473_p5 = scmp.ne.s32.totalorder %s39_s29, %s472_s19  ;;  %p478_p7 = scmp.lt.s32.totalorder %s472_s19, %s472_s19 }
  0x2d   :  { %p479_p8 = por %p478_p7, %p477_p6 }
  0x2f   :  { %p480_p9 = pnand %p479_p8, %p473_p5 }
  0x31   :  { %483 = shalt.err (!%p480_p9)
}
  0x32   :  { %44 = dma.hbm_to_vmem [thread:$0]  %s613_s2, 2048, %s39_s29, [#allocation7], %s513_s22, %s513_s22, %s514_s23  }
  0x33   :  { %506 = dma.done.wait [#allocation4], 128  }
  0x34   :  { %507 = vsyncadd [#allocation4], 4294967168 }
  0x35   :  { %508 = dma.done.wait [#allocation7], 4096  }
  0x36   :  { %509 = vsyncadd [#allocation7], 4294963200  ;;  %v517_v0 = vmov 0.0|0.0   ;;  %vm518_vm0 = vmmov 0   ;;  %v519_v1 = vmov 0.0   ;;  %v60_v2 = vld [vmem:[#allocation6] sm:$0xff] }
  0x37   :  { %361 = vmatprep.subr.bf16.mxu0 %v517_v0  ;;  %323 = vmatprep.mubr.msk.f32.mxu0 %vm518_vm0, %v519_v1  ;;  %v61_v3 = vld [vmem:[#allocation6 + $0x8] sm:$0xff]  ;;  %v62_v4 = vld [vmem:[#allocation6 + $0x10] sm:$0xff]  ;;  %v63_v6 = vld [vmem:[#allocation6 + $0x18] sm:$0xff]  ;;  %s520_s2 = smov [#allocation9]  }
  0x38   :  { %385 = vmatprep.subr.bf16.mxu1 %v517_v0  ;;  %358 = vmatprep.mubr.msk.f32.mxu1 %vm518_vm0, %v519_v1  ;;  %v362_v5 = vpack.c.bf16 %v61_v3, %v60_v2  ;;  %v365_v7 = vpack.c.bf16 %v63_v6, %v62_v4  ;;  %v64_v8 = vld [vmem:[#allocation6 + $0x20] sm:$0xff]  ;;  %v65_v9 = vld [vmem:[#allocation6 + $0x28] sm:$0xff]  ;;  %v150_v12 = vld [vmem:[#allocation8 + $0x10] sm:$0xff]  ;;  %s247_s21 = sshll.u32 %s520_s2, 4  ;;  %s248_s21 = int_to_ptr.vmem [resolvable:$true] %s247_s21 }
  0x39   :  { %v148_v10 = vld [vmem:[#allocation8] sm:$0xff]  ;;  %v149_v11 = vld [vmem:[#allocation8 + $0x8] sm:$0xff]  ;;  %v151_v13 = vld [vmem:[#allocation8 + $0x18] sm:$0xff]  ;;  %v368_v14 = vpack.c.bf16 %v65_v9, %v64_v8  ;;  %s484_s22 = scalar_lea.vmem %s248_s21, 128  ;;  %p489_p11 = scmp.lt.s32.totalorder %s248_s21, %s248_s21 }
  0x3a   :  { %363 = vmatpush3.bf16.msra.mxu0 %v362_v5  ;;  %v386_v15 = vpack.c.bf16 %v149_v11, %v148_v10  ;;  %v66_v16 = vld [vmem:[#allocation6 + $0x30] sm:$0xff]  ;;  %v67_v17 = vld [vmem:[#allocation6 + $0x38] sm:$0xff]  ;;  %v389_v18 = vpack.c.bf16 %v151_v13, %v150_v12  ;;  %v152_v19 = vld [vmem:[#allocation8 + $0x20] sm:$0xff]  ;;  %p485_p10 = scmp.ne.s32.totalorder %s248_s21, %s484_s22  ;;  %p490_p12 = scmp.lt.s32.totalorder %s484_s22, %s484_s22 }
  0x3b   :  { %364 = vmatprep.subr.bf16.mxu0 %v517_v0  ;;  %v153_v20 = vld [vmem:[#allocation8 + $0x28] sm:$0xff]  ;;  %v371_v21 = vpack.c.bf16 %v67_v17, %v66_v16  ;;  %v68_v22 = vld [vmem:[#allocation6 + $0x40] sm:$0xff]  ;;  %v154_v25 = vld [vmem:[#allocation8 + $0x30] sm:$0xff] }
  0x3c   :  { %387 = vmatpush3.bf16.msra.mxu1 %v386_v15  ;;  %v69_v23 = vld [vmem:[#allocation6 + $0x48] sm:$0xff]  ;;  %v392_v24 = vpack.c.bf16 %v153_v20, %v152_v19  ;;  %v155_v26 = vld [vmem:[#allocation8 + $0x38] sm:$0xff]  ;;  %v70_v28 = vld [vmem:[#allocation6 + $0x50] sm:$0xff]  ;;  %p491_p13 = por %p490_p12, %p489_p11 }
  0x3d   :  { %388 = vmatprep.subr.bf16.mxu1 %v517_v0  ;;  %v374_v27 = vpack.c.bf16 %v69_v23, %v68_v22  ;;  %v71_v29 = vld [vmem:[#allocation6 + $0x58] sm:$0xff]  ;;  %v395_v30 = vpack.c.bf16 %v155_v26, %v154_v25  ;;  %v156_v31 = vld [vmem:[#allocation8 + $0x40] sm:$0xff]  ;;  %v157_v32 = vld [vmem:[#allocation8 + $0x48] sm:$0xff] }
  0x3e   :  { %366 = vmatpush3.bf16.msra.mxu0 %v365_v7  ;;  %v377_v33 = vpack.c.bf16 %v71_v29, %v70_v28  ;;  %v72_v34 = vld [vmem:[#allocation6 + $0x60] sm:$0xff]  ;;  %v73_v35 = vld [vmem:[#allocation6 + $0x68] sm:$0xff]  ;;  %v398_v36 = vpack.c.bf16 %v157_v32, %v156_v31  ;;  %v158_v37 = vld [vmem:[#allocation8 + $0x50] sm:$0xff]  ;;  %p492_p0 = pnand %p491_p13, %p485_p10 }
  0x3f   :  { %367 = vmatprep.subr.bf16.mxu0 %v517_v0  ;;  %v159_v38 = vld [vmem:[#allocation8 + $0x58] sm:$0xff]  ;;  %v380_v39 = vpack.c.bf16 %v73_v35, %v72_v34  ;;  %v74_v40 = vld [vmem:[#allocation6 + $0x70] sm:$0xff]  ;;  %v160_v43 = vld [vmem:[#allocation8 + $0x60] sm:$0xff] }
  0x40   :  { %390 = vmatpush3.bf16.msra.mxu1 %v389_v18  ;;  %v75_v41 = vld [vmem:[#allocation6 + $0x78] sm:$0xff]  ;;  %v401_v42 = vpack.c.bf16 %v159_v38, %v158_v37  ;;  %v161_v44 = vld [vmem:[#allocation8 + $0x68] sm:$0xff]  ;;  %v162_v48 = vld [vmem:[#allocation8 + $0x70] sm:$0xff] }
  0x41   :  { %391 = vmatprep.subr.bf16.mxu1 %v517_v0  ;;  %v383_v45 = vpack.c.bf16 %v75_v41, %v74_v40  ;;  %v404_v46 = vpack.c.bf16 %v161_v44, %v160_v43  ;;  %v59_v47 = vld [vmem:[#allocation3] sm:$0xff] }
  0x42   :  { %369 = vmatpush3.bf16.msra.mxu0 %v368_v14  ;;  %v163_v49 = vld [vmem:[#allocation8 + $0x78] sm:$0xff] }
  0x43   :  { %370 = vmatprep.subr.bf16.mxu0 %v517_v0  ;;  %v407_v50 = vpack.c.bf16 %v163_v49, %v162_v48 }
  0x44   :  { %393 = vmatpush3.bf16.msra.mxu1 %v392_v24 }
  0x45   :  { %394 = vmatprep.subr.bf16.mxu1 %v517_v0 }
  0x46   :  { %372 = vmatpush3.bf16.msra.mxu0 %v371_v21 }
  0x47   :  { %373 = vmatprep.subr.bf16.mxu0 %v517_v0 }
  0x48   :  { %396 = vmatpush3.bf16.msra.mxu1 %v395_v30 }
  0x49   :  { %397 = vmatprep.subr.bf16.mxu1 %v517_v0 }
  0x4a   :  { %375 = vmatpush3.bf16.msra.mxu0 %v374_v27 }
  0x4b   :  { %376 = vmatprep.subr.bf16.mxu0 %v517_v0 }
  0x4c   :  { %399 = vmatpush3.bf16.msra.mxu1 %v398_v36 }
  0x4d   :  { %400 = vmatprep.subr.bf16.mxu1 %v517_v0 }
  0x4e   :  { %378 = vmatpush3.bf16.msra.mxu0 %v377_v33 }
  0x4f   :  { %379 = vmatprep.subr.bf16.mxu0 %v517_v0 }
  0x50   :  { %402 = vmatpush3.bf16.msra.mxu1 %v401_v42 }
  0x51   :  { %403 = vmatprep.subr.bf16.mxu1 %v517_v0 }
  0x52   :  { %381 = vmatpush3.bf16.msra.mxu0 %v380_v39 }
  0x53   :  { %382 = vmatprep.subr.bf16.mxu0 %v517_v0 }
  0x54   :  { %405 = vmatpush3.bf16.msra.mxu1 %v404_v46 }
  0x55   :  { %406 = vmatprep.subr.bf16.mxu1 %v517_v0 }
  0x56   :  { %384 = vmatpush3.bf16.msra.mxu0 %v383_v45 }
  0x58   :  { %408 = vmatpush3.bf16.msra.mxu1 %v407_v50 }
  0x59   :  { %324 = vmatmul.mubr.f32.vlgmr.msra.gmra.mrb[0].mxu0 %v59_v47 }
 0x12c   :  { %v142_v51 = vpop.f32.mrb[0].mxu0 }
 0x12d   :  { %v146_v52 = vmax.f32 %v142_v51, 0.0  ;;  %v325_v53 = vpop.f32.mrb[1].mxu0 }
 0x12f   :  { %359 = vmatmul.mubr.f32.vlgmr.msra.gmra.mrb[0].mxu1 %v146_v52 }
 0x202   :  { %v230_v54 = vpop.f32.mrb[0].mxu1 }
 0x203   :  { %240 = vst [vmem:[#allocation9] sm:$0xff] %v230_v54  ;;  %v360_v55 = vpop.f32.mrb[1].mxu1 }
 0x204   :  { %495 = shalt.err (!%p492_p0)
}
 0x205   :  { %s496_s25 = scalar_lea.hbm %s614_s3, 128 }
 0x206   :  { %p497_p1 = scmp.ne.s32.totalorder %s614_s3, %s496_s25  ;;  %p500_p2 = scmp.lt.u32.totalorder %s496_s25, %s614_s3 }
 0x208   :  { %p502_p3 = pnand %p500_p2, %p497_p1 }
 0x20a   :  { %505 = shalt.err (!%p502_p3)
}
 0x20b   :  { %250 = dma.vmem_to_hbm [thread:$0]  %s248_s21, 128, %s614_s3, [#allocation5]  }
 0x20c   :  { %510 = dma.done.wait [#allocation5], 128  }
 0x20d   :  { %511 = vsyncadd [#allocation5], 4294967168 }
 0x20e   :  { %254 = vsyncpa [#allocation4], 1 }
 0x20f   :  { %255 = vsyncpa [#allocation7], 1 }
 0x210   :  { %256 = vsyncpa [#allocation5], 1 }

</bundles_post_ra>
